<compile_context>
chip_gen: v5e
topology: v5e:2x2
jax: 0.10.0
libtpu: 0.0.40
codegen_flags: <defaults>
</compile_context>

<pallas_src>
import jax
import jax.numpy as jnp
from jax.experimental import pallas as pl
from jax.experimental.pallas import tpu as pltpu


_LANES = 128
_SUBLANES = 8
# Per-buffer VMEM budget for one (1, C, TR, 128) tile. With double-buffered
# input + output (4 buffers) this stays well under the 32 MiB scoped default
# everywhere and comfortably inside v7x's 64 MiB physical VMEM.
_TILE_BYTES = 2 * 1024 * 1024


def _sse_kernel(x_ref, w_ref, b_ref, o_ref):
    # x_ref: (1, C, TR, 128) VMEM  activation tile (spatial on sublane/lane)
    # w_ref: (C,)            SMEM  1x1-conv weight (C -> 1)
    # b_ref: (1,)            SMEM  1x1-conv bias
    # o_ref: (1, C, TR, 128) VMEM
    x = x_ref[...]
    c_dim = x.shape[1]
    # Per-pixel channel reduction on the VPU; accumulate logits in float32.
    # Deliberately NOT an MXU matmul: an M=1 contraction wastes the array.
    acc = x[0, 0].astype(jnp.float32) * w_ref[0]
    for c in range(1, c_dim):
        acc = acc + x[0, c].astype(jnp.float32) * w_ref[c]
    att = jax.nn.sigmoid(acc + b_ref[0])                      # (TR, 128) f32
    o_ref[...] = (x * att[None, None, :, :]).astype(o_ref.dtype)


def spatial_se(x, weight, bias):
    """SpatialSELayer forward. x: (B, C, H, W); weight: (C,); bias: (1,)."""
    B, C, H, W = x.shape
    S = H * W
    itemsize = jnp.dtype(x.dtype).itemsize

    # ---- Spatial tiling: S -> (rows, 128), row tile a multiple of 8. ----
    rows = pl.cdiv(S, _LANES)
    bytes_per_row = C * _LANES * itemsize
    budget_rows = max(
        _SUBLANES, (_TILE_BYTES // bytes_per_row) // _SUBLANES * _SUBLANES
    )
    rows_round = pl.cdiv(rows, _SUBLANES) * _SUBLANES
    tile_rows = min(budget_rows, rows_round)
    rows_pad = pl.cdiv(rows, tile_rows) * tile_rows
    s_pad = rows_pad * _LANES

    x3 = x.reshape(B, C, S)
    if s_pad != S:
        # Zero padding is safe: padded pixels give sigmoid(bias) * 0 = 0 and
        # are sliced off below; keeps every tile 8x128 aligned (lane-dense
        # unmasked stores).
        x3 = jnp.pad(x3, ((0, 0), (0, 0), (0, s_pad - S)))
    x4 = x3.reshape(B, C, rows_pad, _LANES)

    w1 = weight.reshape(C).astype(jnp.float32)
    b1 = bias.reshape(1).astype(jnp.float32)

    grid = (B, rows_pad // tile_rows)
    block = (1, C, tile_rows, _LANES)
    block_bytes = C * tile_rows * _LANES * itemsize
    # in + out, double buffered, plus headroom; capped so it fits v7x VMEM.
    vmem_limit = min(64 * 1024 * 1024, max(16 * 1024 * 1024, 6 * block_bytes))

    out = pl.pallas_call(
        _sse_kernel,
        out_shape=jax.ShapeDtypeStruct((B, C, rows_pad, _LANES), x.dtype),
        grid_spec=pltpu.PrefetchScalarGridSpec(
            num_scalar_prefetch=0,
            grid=grid,
            in_specs=[
                pl.BlockSpec(block, lambda b, s: (b, 0, s, 0)),
                pl.BlockSpec(memory_space=pltpu.MemorySpace.SMEM),   # weight
                pl.BlockSpec(memory_space=pltpu.MemorySpace.SMEM),   # bias
            ],
            out_specs=pl.BlockSpec(block, lambda b, s: (b, 0, s, 0)),
        ),
        compiler_params=pltpu.CompilerParams(
            dimension_semantics=("parallel", "parallel"),
            vmem_limit_bytes=vmem_limit,
        ),
        cost_estimate=pl.CostEstimate(
            flops=3 * B * C * S,
            transcendentals=B * S,
            bytes_accessed=2 * B * C * S * itemsize,
        ),
    )(x4, w1, b1)

    return out.reshape(B, C, s_pad)[:, :, :S].reshape(B, C, H, W)


def spatial_se_ref(x, weight, bias):
    # Pure-JAX reference of the PyTorch forward (weights=None branch).
    logits = jnp.einsum("bchw,c->bhw", x, weight) + bias[0]
    att = jax.nn.sigmoid(logits)[:, None, :, :]
    return x * att


if __name__ == "__main__":
    B, C, H, W = 2, 4, 16, 16
    key = jax.random.PRNGKey(0)
    kx, kw, kb = jax.random.split(key, 3)

    x = jax.random.normal(kx, (B, C, H, W), dtype=jnp.float32)
    # Deterministic "Conv2d(C, 1, 1)" params (kaiming-uniform-ish bound 1/sqrt(C)).
    bound = 1.0 / jnp.sqrt(jnp.float32(C))
    weight = jax.random.uniform(kw, (C,), jnp.float32, -bound, bound)
    bias = jax.random.uniform(kb, (1,), jnp.float32, -bound, bound)

    out = spatial_se(x, weight, bias)
    out = jax.block_until_ready(out)

    ref = spatial_se_ref(x, weight, bias)
    assert out.shape == (B, C, H, W)
    assert jnp.allclose(out, ref, atol=1e-5, rtol=1e-5)
    print("KERNEL_OK")
</pallas_src>

<mosaic_0001>
module attributes {stable_mosaic.version = 11 : i64} {
  func.func @_sse_kernel(%arg0: i32, %arg1: i32, %arg2: memref<1x4x8x128xf32, #tpu.memory_space<vmem>>, %arg3: memref<4xf32, #tpu.memory_space<smem>>, %arg4: memref<1xf32, #tpu.memory_space<smem>>, %arg5: memref<1x4x8x128xf32, #tpu.memory_space<vmem>>) attributes {dimension_semantics = [#tpu.dimension_semantics<parallel>, #tpu.dimension_semantics<parallel>], iteration_bounds = array<i64: 2, 1>, scalar_prefetch = 0 : i64, scratch_operands = 0 : i64, tpu.core_type = #tpu.core_type<tc>, window_params = [{transform_indices = @transform_0, window_bounds = array<i64: 1, 4, 8, 128>}, {transform_indices = @transform_1, window_bounds = array<i64: 4>}, {transform_indices = @transform_2, window_bounds = array<i64: 1>}, {transform_indices = @transform_3, window_bounds = array<i64: 1, 4, 8, 128>}]} {
    %c0 = arith.constant 0 : index
    %c0_0 = arith.constant 0 : index
    %c0_1 = arith.constant 0 : index
    %c0_2 = arith.constant 0 : index
    %0 = vector.load %arg2[%c0, %c0_0, %c0_1, %c0_2] : memref<1x4x8x128xf32, #tpu.memory_space<vmem>>, vector<1x4x8x128xf32>
    %1 = vector.extract_strided_slice %0 {offsets = [0, 0, 0, 0], sizes = [1, 1, 8, 128], strides = [1, 1, 1, 1]} : vector<1x4x8x128xf32> to vector<1x1x8x128xf32>
    %2 = vector.shape_cast %1 : vector<1x1x8x128xf32> to vector<8x128xf32>
    %c0_3 = arith.constant 0 : index
    %3 = memref.load %arg3[%c0_3] : memref<4xf32, #tpu.memory_space<smem>>
    %4 = vector.broadcast %3 : f32 to vector<8x128xf32>
    %5 = arith.mulf %2, %4 : vector<8x128xf32>
    %6 = vector.extract_strided_slice %0 {offsets = [0, 1, 0, 0], sizes = [1, 1, 8, 128], strides = [1, 1, 1, 1]} : vector<1x4x8x128xf32> to vector<1x1x8x128xf32>
    %7 = vector.shape_cast %6 : vector<1x1x8x128xf32> to vector<8x128xf32>
    %c1 = arith.constant 1 : index
    %8 = memref.load %arg3[%c1] : memref<4xf32, #tpu.memory_space<smem>>
    %9 = vector.broadcast %8 : f32 to vector<8x128xf32>
    %10 = arith.mulf %7, %9 : vector<8x128xf32>
    %11 = arith.addf %5, %10 : vector<8x128xf32>
    %12 = vector.extract_strided_slice %0 {offsets = [0, 2, 0, 0], sizes = [1, 1, 8, 128], strides = [1, 1, 1, 1]} : vector<1x4x8x128xf32> to vector<1x1x8x128xf32>
    %13 = vector.shape_cast %12 : vector<1x1x8x128xf32> to vector<8x128xf32>
    %c2 = arith.constant 2 : index
    %14 = memref.load %arg3[%c2] : memref<4xf32, #tpu.memory_space<smem>>
    %15 = vector.broadcast %14 : f32 to vector<8x128xf32>
    %16 = arith.mulf %13, %15 : vector<8x128xf32>
    %17 = arith.addf %11, %16 : vector<8x128xf32>
    %18 = vector.extract_strided_slice %0 {offsets = [0, 3, 0, 0], sizes = [1, 1, 8, 128], strides = [1, 1, 1, 1]} : vector<1x4x8x128xf32> to vector<1x1x8x128xf32>
    %19 = vector.shape_cast %18 : vector<1x1x8x128xf32> to vector<8x128xf32>
    %c3 = arith.constant 3 : index
    %20 = memref.load %arg3[%c3] : memref<4xf32, #tpu.memory_space<smem>>
    %21 = vector.broadcast %20 : f32 to vector<8x128xf32>
    %22 = arith.mulf %19, %21 : vector<8x128xf32>
    %23 = arith.addf %17, %22 : vector<8x128xf32>
    %c0_4 = arith.constant 0 : index
    %24 = memref.load %arg4[%c0_4] : memref<1xf32, #tpu.memory_space<smem>>
    %25 = vector.broadcast %24 : f32 to vector<8x128xf32>
    %26 = arith.addf %23, %25 : vector<8x128xf32>
    %27 = arith.negf %26 : vector<8x128xf32>
    %28 = math.exp %27 : vector<8x128xf32>
    %cst = arith.constant 1.000000e+00 : f32
    %29 = vector.broadcast %cst : f32 to vector<8x128xf32>
    %30 = arith.addf %29, %28 : vector<8x128xf32>
    %31 = arith.divf %29, %30 : vector<8x128xf32>
    %32 = vector.shape_cast %31 : vector<8x128xf32> to vector<1x1x8x128xf32>
    %33 = vector.broadcast %32 : vector<1x1x8x128xf32> to vector<1x4x8x128xf32>
    %34 = arith.mulf %0, %33 : vector<1x4x8x128xf32>
    %c0_5 = arith.constant 0 : index
    %c0_6 = arith.constant 0 : index
    %c0_7 = arith.constant 0 : index
    %c0_8 = arith.constant 0 : index
    %35 = vector.load %arg5[%c0_5, %c0_6, %c0_7, %c0_8] : memref<1x4x8x128xf32, #tpu.memory_space<vmem>>, vector<1x4x8x128xf32>
    tpu.vector_store %arg5[%c0_5, %c0_6, %c0_7, %c0_8], %34 {strides = array<i32>} : memref<1x4x8x128xf32, #tpu.memory_space<vmem>>, vector<1x4x8x128xf32>,
    return
  }
  func.func @transform_0(%arg0: i32, %arg1: i32) -> (i32, i32, i32, i32) {
    %c0_i32 = arith.constant 0 : i32
    %c0_i32_0 = arith.constant 0 : i32
    %c0_i32_1 = arith.constant 0 : i32
    return %arg0, %c0_i32, %arg1, %c0_i32_0 : i32, i32, i32, i32
  }
  func.func @transform_1(%arg0: i32, %arg1: i32) -> i32 {
    %c0_i32 = arith.constant 0 : i32
    %c0_i32_0 = arith.constant 0 : i32
    return %c0_i32 : i32
  }
  func.func @transform_2(%arg0: i32, %arg1: i32) -> i32 {
    %c0_i32 = arith.constant 0 : i32
    %c0_i32_0 = arith.constant 0 : i32
    return %c0_i32 : i32
  }
  func.func @transform_3(%arg0: i32, %arg1: i32) -> (i32, i32, i32, i32) {
    %c0_i32 = arith.constant 0 : i32
    %c0_i32_0 = arith.constant 0 : i32
    %c0_i32_1 = arith.constant 0 : i32
    return %arg0, %c0_i32, %arg1, %c0_i32_0 : i32, i32, i32, i32
  }
}

</mosaic_0001>

<bundles_post_ra>
// kernel: tpu_custom_call.1
= control target key start
LH: loop header
LB: loop body
LE: loop exit
PB: predicated region body
PF: predicated region fallthrough
CT: control target
= control target key end

     0   :  { %s806_s0 = inlined_call_operand.hbm [shape: f32[2,4,8,128], index: 0, kind: input, shape index: {}]   ;;  %s807_s1 = inlined_call_operand.vmem [shape: f32[4], index: 1, kind: input, shape index: {}]   ;;  %s808_s2 = inlined_call_operand.<no memory space> [shape: f32[1], index: 2, kind: input, shape index: {}]   ;;  %s809_s3 = inlined_call_operand.hbm [shape: f32[2,4,8,128], index: 3, kind: output, shape index: {}]  }
   0x1   :  { %8 = sst [smem:[#allocation2]] %s808_s2 }
   0x2   :  { %9 = vsyncpa [#allocation4], 0 }
   0x3   :  { %11 = vsyncpa [#allocation4 + $0x1], 0 }
   0x4   :  { %12 = vsyncpa [#allocation6], 0 }
   0x5   :  { %13 = vsyncpa [#allocation5], 0 }
   0x6   :  { %15 = vsyncpa [#allocation5 + $0x1], 0  ;;  %s651_s14 = smov 0   ;;  %s653_s15 = smov 0  }
   0x7   :  { %s655_s16 = smov 0   ;;  %s657_s17 = smov 0  }
   0x8   :  { %s659_s18 = smov 0   ;;  %s661_s19 = smov 0  }
   0x9 LB: > { %s386_s2 = sadd.s32 4294967295, %s621_s19   ;;  %s387_s20 = sadd.s32 4294967294, %s621_s19   ;;  %s621_s19 = sphi %s661_s19, %s21_s19   ;;  %s617_s18 = sphi %s659_s18, %s821_s18   ;;  %s613_s17 = sphi %s657_s17, %s820_s17   ;;  %s609_s16 = sphi %s655_s16, %s819_s16   ;;  %s605_s15 = sphi %s653_s15, %s818_s15   ;;  %s601_s14 = sphi %s651_s14, %s817_s14  }
   0xa   : > { %s42_s21 = sadd.s32 1, %s609_s16  ;;  %p49_p0 = scmp.ne.s32.totalorder %s609_s16, %s605_s15 }
   0xb   : > { %p50_p1 = scmp.eq.s32.totalorder %s621_s19, 0  ;;  %p55_p2 = scmp.ne.s32.totalorder %s605_s15, %s601_s14 }
   0xc   : > { %p689_p3 = scmp.eq.s32.totalorder %s386_s2, 0  ;;  %p123_p4 = scmp.eq.s32.totalorder %s386_s2, 1 }
   0xd   : > { %p693_p5 = por %p50_p1, %p49_p0  ;;  %p129_p6 = scmp.eq.s32.totalorder %s387_s20, 1 }
   0xe   : > { %p699_p7 = por %p689_p3, %p55_p2  ;;  %p703_p8 = por %p123_p4, %p49_p0 }
   0xf   : > { %p707_p9 = por %p129_p6, %p55_p2  ;;  %p388_p10 = scmp.ge.s32.totalorder %s621_s19, 1 }
  0x10   : > { %p136_p11 = scmp.lt.s32.totalorder %s621_s19, 3  ;;  %s148_s29 = sshll.u32 %s807_s1, 4  ;;  %s149_s29 = int_to_ptr.vmem [resolvable:$true] %s148_s29 }
  0x11   : > { %p390_p13 = scmp.ge.s32.totalorder %s621_s19, 2  ;;  %p430_p0 = scmp.lt.s32.totalorder %s621_s19, 2 }
  0x12   : > { %p716_p12 = pnand %p388_p10, %p136_p11  ;;  %s33_s5 = sadd.s32 1, %s617_s18 }
  0x13   : > { %p726_p2 = pnand %p430_p0, %p693_p5  ;;  %p35_p6 = scmp.ge.s32.totalorder %s33_s5, 2 }
  0x14   : > { %p417_p1 = pneg %p716_p12  ;;  %s162_s6 = sand.u32 1, %s609_s16  }
  0x15   : > { %s623_s7 = smov [#allocation7]   ;;  %s823_s5 = smov (%p35_p6, %s33_s5), 0 }
  0x16   : > { %p418_p4 = pnand %p417_p1, %p689_p3  ;;  %s391_s8 = sshll.u32 %s162_s6, 5 }
  0x17   : > { %s37_s9 = ssub.s32 %s617_s18, %s823_s5  ;;  %s407_s10 = sshll.u32 %s617_s18, 5 }
  0x18   : > { %420 = dma.vmem_to_smem (!%p418_p4), %s149_s29, 16, %s623_s7, [#allocation6]  }
  0x19   : > { %p40_p10 = scmp.eq.s32.totalorder %s37_s9, 0  ;;  %s172_s13 = scalar_lea.hbm %s806_s0, %s407_s10 }
  0x1a   : > { %s166_s2 = scalar_lea.vmem [#allocation3], %s391_s8  ;;  %s173_s27 = sshll.u32 %s172_s13, 4  ;;  %s174_s27 = int_to_ptr.hbm [resolvable:$true] %s173_s27 }
  0x1b   : > { %s175_s20 = sshll.u32 %s166_s2, 4  ;;  %s163_s28 = scalar_lea.sflag [#allocation4], %s162_s6  ;;  %s176_s20 = int_to_ptr.vmem [resolvable:$true] %s175_s20 }
  0x1c   : > { %s745_s23 = scalar_select %p40_p10, %s609_s16, %s42_s21  }
  0x1d   : > { %s624_s29 = smov 128   ;;  %s625_s7 = smov 8  }
  0x1e   : > { %424 = dma.hbm_to_vmem [thread:$0]  (!%p726_p2), %s174_s27, 512, %s176_s20, %s163_s28, %s624_s29, %s624_s29, %s625_s7  }
  0x1f   : > { %187 = sbr.rel (%p716_p12) target bundleno = 96 (0x60), region = 32  ;;  %s752_s9 = sand.u32 (!%p716_p12), 1, %s605_s15  }
  0x20   : > { %s395_s21 = sshll.u32 (!%p716_p12), %s752_s9, 5  ;;  %s190_s8 = scalar_lea.sflag (!%p716_p12), [#allocation4], %s752_s9 }
  0x21   : > { %s193_s10 = scalar_lea.vmem (!%p716_p12), [#allocation3], %s395_s21 }
  0x24   : > { %588 = dma.done.wait (%p699_p7), %s190_s8, 512  }
  0x25   : > { %590 = vsyncadd (%p699_p7), %s190_s8, 4294966784 }
  0x26   : > { %592 = dma.done.wait (%p689_p3), [#allocation6], 16  }
  0x27   : > { %594 = vsyncadd (%p689_p3), [#allocation6], 4294967280 }
  0x28   : > { %204 = sfence }
  0x29   : > { %s227_s30 = sld [smem:[#allocation7]]  ;;  %v223_v0 = vld [vmem:[%s193_s10] sm:$0xff]  ;;  %v224_v1 = vld [vmem:[%s193_s10 + $0x8] sm:$0xff]  ;;  %v225_v2 = vld [vmem:[%s193_s10 + $0x10] sm:$0xff]  ;;  %s408_s22 = sshll.u32 %s613_s17, 5 }
  0x2a   : > { %s398_s4 = sld [smem:[#allocation7 + $0x1]]  ;;  %v226_v4 = vld [vmem:[%s193_s10 + $0x18] sm:$0xff]  ;;  %s285_s2 = scalar_lea.hbm %s809_s3, %s408_s22 }
  0x2b   : > { %s399_s6 = sld [smem:[#allocation7 + $0x2]]  ;;  %s222_s20 = scalar_lea.vmem [#allocation8], %s395_s21 }
  0x2c   : > { %s400_s11 = sld [smem:[#allocation7 + $0x3]]  ;;  %s286_s27 = sshll.u32 %s222_s20, 4  ;;  %s287_s27 = int_to_ptr.vmem [resolvable:$true] %s286_s27 }
  0x2d   : > { %s242_s12 = sld [smem:[#allocation2]]  ;;  %s288_s28 = sshll.u32 %s285_s2, 4  ;;  %s289_s28 = int_to_ptr.hbm [resolvable:$true] %s288_s28 }
  0x2e   : > { %s273_s17 = scalar_lea.sflag [#allocation5], %s752_s9  ;;  %s549_s29 = sshra.s32 %s289_s28, 4  ;;  %s550_s29 = int_to_ptr.hbm [resolvable:$true] %s549_s29 }
  0x2f   : > { %v228_v3 = vstv %s227_s30  ;;  %s551_s7 = scalar_lea.hbm %s550_s29, 32  ;;  %s555_s10 = scalar_lea.hbm %s809_s3, 64 }
  0x30   : > { %v229_v5 = vmul.f32 %v228_v3, %v223_v0  ;;  %v231_v6 = vstv %s398_s4  ;;  %p552_p3 = scmp.ne.s32.totalorder %s550_s29, %s551_s7  ;;  %p556_p11 = scmp.lt.s32.totalorder %s550_s29, %s809_s3 }
  0x31   : > { %v232_v7 = vmul.f32 %v231_v6, %v224_v1  ;;  %v235_v8 = vstv %s399_s6  ;;  %p557_p12 = scmp.lt.s32.totalorder %s555_s10, %s551_s7 }
  0x32   : > { %v236_v9 = vmul.f32 %v235_v8, %v225_v2  ;;  %v239_v10 = vstv %s400_s11  ;;  %p553_p5 = pnand %p552_p3, %p703_p8 }
  0x33   : > { %v233_v11 = vadd.f32 %v232_v7, %v229_v5  ;;  %v240_v12 = vmul.f32 %v239_v10, %v226_v4  ;;  %v243_v14 = vstv %s242_s12  ;;  %p558_p0 = por %p557_p12, %p556_p11 }
  0x34   : > { %p554_p7 = pneg %p553_p5 }
  0x35   : > { %v237_v13 = vadd.f32 %v236_v9, %v233_v11 }
  0x36   : > { %p559_p1 = pnand %p558_p0, %p554_p7 }
  0x37   : > { %v241_v15 = vadd.f32 %v240_v12, %v237_v13 }
  0x39   : > { %v244_v16 = vadd.f32 %v243_v14, %v241_v15 }
  0x3b   : > { %v401_v17 = vmul.f32 -1.442695, %v244_v16 }
  0x3d   : > { %486 = vpow2.f32 %v401_v17 }
  0x43   : > { %v487_v18 = vpop.eup %486 }
  0x44   : > { %v248_v19 = vadd.f32 1.0, %v487_v18 }
  0x46   : > { %488 = vrcp.f32 %v248_v19  ;;  %v260_v22 = vand.u32 2147483648, %v248_v19  ;;  %vm254_vm0 = vweird.f32 %v248_v19  ;;  %v258_v24 = vand.u32 2147483647, %v248_v19 }
  0x48   : > { %v261_v26 = vor.u32 1.1754944e-38, %v260_v22  ;;  %vm259_vm3 = vcmp.eq.f32.partialorder %v258_v24, 8.507059e+37 }
  0x4c   : > { %v489_v20 = vpop.eup %488 }
  0x4d   : > { %v250_v21 = vmul.f32 %v489_v20, %v248_v19  ;;  %vm255_vm1 = vweird.f32 %v489_v20 }
  0x4e   : > { %vm256_vm2 = vmor %vm254_vm0, %vm255_vm1 }
  0x4f   : > { %v251_v23 = vsub.f32 1.0, %v250_v21 }
  0x51   : > { %v252_v25 = vmul.f32 %v489_v20, %v251_v23 }
  0x53   : > { %v253_v27 = vadd.f32 %v489_v20, %v252_v25 }
  0x55   : > { %v257_v28 = vsel %vm256_vm2, %v489_v20, %v253_v27 }
  0x56   : > { %v262_v29 = vsel %vm259_vm3, %v261_v26, %v257_v28 }
  0x57   : > { %v264_v30 = vmul.f32 %v262_v29, %v223_v0  ;;  %v265_v31 = vmul.f32 %v262_v29, %v224_v1  ;;  %v266_v32 = vmul.f32 %v262_v29, %v225_v2  ;;  %v267_v33 = vmul.f32 %v262_v29, %v226_v4 }
  0x59   : > { %268 = vst [vmem:[%s222_s20] sm:$0xff] %v264_v30 }
  0x5a   : > { %269 = vst [vmem:[%s222_s20 + $0x8] sm:$0xff] %v265_v31 }
  0x5b   : > { %270 = vst [vmem:[%s222_s20 + $0x10] sm:$0xff] %v266_v32 }
  0x5c   : > { %271 = vst [vmem:[%s222_s20 + $0x18] sm:$0xff] %v267_v33 }
  0x5d   : > { %562 = shalt.err (!%p559_p1)
}
  0x5e   : > { %s626_s9 = smov 128   ;;  %s627_s6 = smov 8  }
  0x5f   : > { %415 = dma.vmem_to_hbm [thread:$0]  (%p703_p8), %s287_s27, 512, %s289_s28, %s273_s17, %s626_s9, %s626_s9, %s627_s6  }
  0x60 PF: > { %s303_s11 = sand.u32 1, %s601_s14   ;;  %p426_p2 = pnand %p390_p13, %p707_p9 }
  0x61   : > { %s304_s12 = scalar_lea.sflag [#allocation5], %s303_s11 }
  0x62   : > { %p427_p4 = pneg %p426_p2 }
  0x64   : > { %596 = dma.done.wait (%p427_p4), %s304_s12, 512  }
  0x65   : > { %598 = vsyncadd (%p427_p4), %s304_s12, 4294966784  ;;  %s21_s19 = sadd.s32 1, %s621_s19   ;;  %s817_s14 = smov %s605_s15 }
  0x66   : > { %p18_p6 = scmp.ge.s32.totalorder %s21_s19, 4   ;;  %s818_s15 = smov %s609_s16 }
  0x67   : > { %s819_s16 = smov %s745_s23  ;;  %s820_s17 = smov %s617_s18 }
  0x68   : > { %s821_s18 = smov %s823_s5  ;;  %20 = sbr.rel (!%p18_p6) target bundleno = 9 (0x9), region = 82 }
  0x6d   :  { %310 = vsyncpa [#allocation4], 1 }
  0x6e   :  { %312 = vsyncpa [#allocation4 + $0x1], 1 }
  0x6f   :  { %313 = vsyncpa [#allocation5], 1 }
  0x70   :  { %315 = vsyncpa [#allocation5 + $0x1], 1 }
  0x71   :  { %316 = vsyncpa [#allocation6], 1 }
  0x72   :  { %318 = vsyncpa [#allocation6 + $0x1], 1 }

</bundles_post_ra>
